<compile_context>
chip_gen: v7x
topology: tpu7x:2x2x1
jax: 0.10.0
libtpu: 0.0.40
codegen_flags: <defaults>
</compile_context>

<pallas_src>
import functools

import jax
import jax.numpy as jnp
from jax.experimental import pallas as pl
from jax.experimental.pallas import tpu as pltpu


def _round_up(x, m):
    return (x + m - 1) // m * m


def _choose_tile_v(V, D2, w3_itemsize, tile_v_req, b_hint=8,
                   vmem_budget=28 * 1024 * 1024):
    """Pick a lane-aligned vocab tile that fits a conservative VMEM budget."""
    V128 = _round_up(V, 128)
    tile = _round_up(min(tile_v_req, V128), 128)

    # Leave >= 2 tiles so the 'parallel' vocab axis can split across both
    # TensorCores on v7x megacore parts (no-op concern on v5e/v6e).
    if tile >= V128 and V128 >= 256:
        tile = _round_up(pl.cdiv(V128, 2), 128)

    def vmem_bytes(t):
        streamed = 2 * t * (D2 * w3_itemsize + b_hint * 4)   # w3 + out (x2 buf)
        resident = _round_up(V, t) * 4 + b_hint * D2 * 4     # b3 + h2
        return streamed + resident

    # Shrink until double-buffered streamed tiles + residents fit the budget
    # (budget chosen for v7x's 64 MiB physical VMEM; v5e/v6e have 128 MiB).
    while tile > 128 and vmem_bytes(tile) > vmem_budget:
        tile -= 128
    return tile


def prepare_cbow_weights(w3, b3, *, tile_v=2048, w3_dtype=None):
    """One-time weight prep, run OUTSIDE jit: choose TILE_V, pad w3/b3 to a
    TILE_V multiple (so the hot path never re-pads), optionally narrow w3's
    streaming dtype (bf16 -> ~2x HBM bandwidth win; numerics tradeoff)."""
    D2, V = w3.shape
    if w3_dtype is not None:
        w3 = w3.astype(w3_dtype)           # b3 stays fp32 (tiny, resident)
    tile = _choose_tile_v(V, D2, jnp.dtype(w3.dtype).itemsize, tile_v)
    V_pad = _round_up(V, tile)
    if V_pad != V:
        w3 = jnp.pad(w3, ((0, 0), (0, V_pad - V)))
        b3 = jnp.pad(b3, ((0, 0), (0, V_pad - V)))
    return w3, b3, tile


def _proj_kernel(h2_ref, w3_ref, b3_ref, out_ref, *, tile_v):
    # h2_ref: (B_pad, D2) resident; w3_ref: (D2, TILE_V) streamed;
    # b3_ref: (1, V_pad) resident; out_ref: (B_pad, TILE_V) streamed.
    j = pl.program_id(0)
    off = pl.multiple_of(j * tile_v, 128)
    b3 = b3_ref[:, pl.ds(off, tile_v)]
    h2 = h2_ref[...].astype(w3_ref.dtype)        # no-op for fp32; bf16 if opted in
    out = jnp.dot(h2, w3_ref[...], preferred_element_type=jnp.float32) + b3
    out_ref[...] = out.astype(out_ref.dtype)


@functools.partial(jax.jit, static_argnames=("tile_v", "vocab_size"))
def cbow_forward(idx, emb_table, w1, b1, w2, b2, w3_padded, b3_padded, *,
                 tile_v, vocab_size):
    B, _C = idx.shape
    _V_emb, D = emb_table.shape
    D2, V_pad = w3_padded.shape
    assert D2 == 2 * D
    TILE_V = tile_v
    V = vocab_size

    # Embedding gather + context sum + the two small Linear layers stay in the
    # wrapper (tiny (B, 2D) tensors); this frees the kernel of resident D*D /
    # D*2D weight blocks and keeps the kernel a pure streamed projection.
    # TODO(synk): data-dependent embedding row gather stays in XLA; an in-kernel
    # version would need PrefetchScalarGridSpec + pl.Element row blocks.
    x = jnp.sum(jnp.take(emb_table, idx, axis=0), axis=1).astype(jnp.float32)
    h2 = (x @ w1 + b1) @ w2 + b2                 # (B, 2D)

    B_pad = _round_up(B, 8)                      # fp32 sublane multiple
    if B_pad != B:
        h2 = jnp.pad(h2, ((0, B_pad - B), (0, 0)))

    grid = (V_pad // TILE_V,)

    # Explicit VMEM limit derived from actual usage (+ headroom), capped well
    # below v7x's 64 MiB physical VMEM.
    w3_item = jnp.dtype(w3_padded.dtype).itemsize
    streamed = 2 * TILE_V * (D2 * w3_item + B_pad * 4)
    resident = B_pad * D2 * 4 + V_pad * jnp.dtype(b3_padded.dtype).itemsize
    vmem_limit = int(min(max(streamed + resident + (4 << 20), 16 << 20), 48 << 20))

    out = pl.pallas_call(
        functools.partial(_proj_kernel, tile_v=TILE_V),
        out_shape=jax.ShapeDtypeStruct((B_pad, V_pad), jnp.float32),
        grid_spec=pltpu.PrefetchScalarGridSpec(
            num_scalar_prefetch=0,
            grid=grid,
            in_specs=[
                pl.BlockSpec((B_pad, D2), lambda j: (0, 0)),     # h2  (resident)
                pl.BlockSpec((D2, TILE_V), lambda j: (0, j)),    # w3  (streamed)
                pl.BlockSpec((1, V_pad), lambda j: (0, 0)),      # b3  (resident)
            ],
            out_specs=pl.BlockSpec((B_pad, TILE_V), lambda j: (0, j)),
        ),
        compiler_params=pltpu.CompilerParams(
            dimension_semantics=("parallel",),   # vocab tiles are independent
            vmem_limit_bytes=vmem_limit,
        ),
    )(h2, w3_padded, b3_padded)

    return out[:B, :V]


def init_params(key, vocab_size, embedding_dim):
    """Deterministic init mirroring PyTorch defaults (Embedding ~ N(0,1),
    Linear ~ U(-1/sqrt(fan_in), 1/sqrt(fan_in)))."""
    D, V = embedding_dim, vocab_size
    ks = jax.random.split(key, 7)

    emb_table = jax.random.normal(ks[0], (V, D), dtype=jnp.float32)

    def linear(kw, kb, fan_in, fan_out):
        bound = 1.0 / jnp.sqrt(jnp.float32(fan_in))
        w = jax.random.uniform(kw, (fan_in, fan_out), jnp.float32, -bound, bound)
        b = jax.random.uniform(kb, (1, fan_out), jnp.float32, -bound, bound)
        return w, b

    w1, b1 = linear(ks[1], ks[2], D, D)
    w2, b2 = linear(ks[3], ks[4], D, 2 * D)
    w3, b3 = linear(ks[5], ks[6], 2 * D, V)
    return emb_table, w1, b1, w2, b2, w3, b3


def reference_forward(idx, emb_table, w1, b1, w2, b2, w3, b3):
    x = jnp.sum(jnp.take(emb_table, idx, axis=0), axis=1)
    h1 = x @ w1 + b1
    h2 = h1 @ w2 + b2
    return h2 @ w3 + b3


if __name__ == "__main__":
    # Small, deterministic example shapes consistent with the module.
    batch = 8
    context_length = 4
    embedding_dim = 128
    vocab_size = 256

    key = jax.random.PRNGKey(0)
    k_idx, k_params = jax.random.split(key)

    idx = jax.random.randint(
        k_idx, (batch, context_length), 0, vocab_size, dtype=jnp.int32
    )
    emb_table, w1, b1, w2, b2, w3, b3 = init_params(
        k_params, vocab_size, embedding_dim
    )

    # One-time weight prep (tile choice + padding) OUTSIDE the jitted hot path.
    w3_p, b3_p, tile_v = prepare_cbow_weights(w3, b3)

    out = cbow_forward(
        idx, emb_table, w1, b1, w2, b2, w3_p, b3_p,
        tile_v=tile_v, vocab_size=vocab_size,
    )
    out = jax.block_until_ready(out)

    ref = reference_forward(idx, emb_table, w1, b1, w2, b2, w3, b3)
    assert out.shape == (batch, vocab_size), out.shape
    assert jnp.allclose(out, ref, atol=1e-3, rtol=1e-3), "mismatch vs reference"

    print("KERNEL_OK")
</pallas_src>

<mosaic_0001>
module attributes {stable_mosaic.version = 11 : i64} {
  func.func @_proj_kernel(%arg0: i32, %arg1: memref<8x256xf32, #tpu.memory_space<vmem>>, %arg2: memref<256x128xf32, #tpu.memory_space<vmem>>, %arg3: memref<1x256xf32, #tpu.memory_space<vmem>>, %arg4: memref<8x128xf32, #tpu.memory_space<vmem>>) attributes {dimension_semantics = [#tpu.dimension_semantics<parallel>], iteration_bounds = array<i64: 2>, scalar_prefetch = 0 : i64, scratch_operands = 0 : i64, tpu.core_type = #tpu.core_type<tc>, window_params = [{pipeline_mode = #tpu.pipeline_mode<synchronous>, transform_indices = @transform_0, window_bounds = array<i64: 8, 256>}, {transform_indices = @transform_1, window_bounds = array<i64: 256, 128>}, {pipeline_mode = #tpu.pipeline_mode<synchronous>, transform_indices = @transform_2, window_bounds = array<i64: 1, 256>}, {transform_indices = @transform_3, window_bounds = array<i64: 8, 128>}]} {
    %c128_i32 = arith.constant 128 : i32
    %0 = arith.muli %arg0, %c128_i32 : i32
    %1 = tpu.assume_multiple %0, 128 : i32
    %c0 = arith.constant 0 : index
    %2 = arith.index_cast %1 : i32 to index
    %3 = vector.load %arg3[%c0, %2] : memref<1x256xf32, #tpu.memory_space<vmem>>, vector<1x128xf32>
    %c0_0 = arith.constant 0 : index
    %c0_1 = arith.constant 0 : index
    %4 = vector.load %arg1[%c0_0, %c0_1] : memref<8x256xf32, #tpu.memory_space<vmem>>, vector<8x256xf32>
    %c0_2 = arith.constant 0 : index
    %c0_3 = arith.constant 0 : index
    %5 = vector.load %arg2[%c0_2, %c0_3] : memref<256x128xf32, #tpu.memory_space<vmem>>, vector<256x128xf32>
    %cst = arith.constant dense<0.000000e+00> : vector<8x128xf32>
    %6 = tpu.matmul %4, %5, %cst {dimension_numbers = #tpu.dot_dimension_numbers<[1], [0], [0], [1], [0, 0, 1, 1], [], []>} : vector<8x256xf32>, vector<256x128xf32>, vector<8x128xf32> -> vector<8x128xf32>
    %7 = vector.broadcast %3 : vector<1x128xf32> to vector<8x128xf32>
    %8 = arith.addf %6, %7 : vector<8x128xf32>
    %c0_4 = arith.constant 0 : index
    %c0_5 = arith.constant 0 : index
    %9 = vector.load %arg4[%c0_4, %c0_5] : memref<8x128xf32, #tpu.memory_space<vmem>>, vector<8x128xf32>
    tpu.vector_store %arg4[%c0_4, %c0_5], %8 {strides = array<i32>} : memref<8x128xf32, #tpu.memory_space<vmem>>, vector<8x128xf32>,
    return
  }
  func.func @transform_0(%arg0: i32) -> (i32, i32) {
    %c0_i32 = arith.constant 0 : i32
    %c0_i32_0 = arith.constant 0 : i32
    %c0_i32_1 = arith.constant 0 : i32
    return %c0_i32, %c0_i32_0 : i32, i32
  }
  func.func @transform_1(%arg0: i32) -> (i32, i32) {
    %c0_i32 = arith.constant 0 : i32
    %c0_i32_0 = arith.constant 0 : i32
    return %c0_i32, %arg0 : i32, i32
  }
  func.func @transform_2(%arg0: i32) -> (i32, i32) {
    %c0_i32 = arith.constant 0 : i32
    %c0_i32_0 = arith.constant 0 : i32
    %c0_i32_1 = arith.constant 0 : i32
    return %c0_i32, %c0_i32_0 : i32, i32
  }
  func.func @transform_3(%arg0: i32) -> (i32, i32) {
    %c0_i32 = arith.constant 0 : i32
    %c0_i32_0 = arith.constant 0 : i32
    return %c0_i32, %arg0 : i32, i32
  }
}

</mosaic_0001>

<bundles_post_ra>
// kernel: cbow_forward.1
= control target key start
LH: loop header
LB: loop body
LE: loop exit
PB: predicated region body
PF: predicated region fallthrough
CT: control target
= control target key end

     0   :  { %8 = vsyncpa [#allocation4], 0  ;;  %s949_s0 = inlined_call_operand.vmem [shape: f32[8,256], index: 0, kind: input, shape index: {}]   ;;  %s950_s1 = inlined_call_operand.vmem [shape: f32[256,256], index: 1, kind: input, shape index: {}]   ;;  %s951_s2 = inlined_call_operand.vmem [shape: f32[1,256], index: 2, kind: input, shape index: {}]   ;;  %s952_s3 = inlined_call_operand.hbm [shape: f32[8,256], index: 3, kind: output, shape index: {}]  }
   0x1   :  { %10 = vsyncpa [#allocation4 + $0x1], 0  ;;  %s728_s12 = smov 0   ;;  %s730_s13 = smov 0  }
   0x2   :  { %s732_s14 = smov 0   ;;  %s734_s15 = smov 0  }
   0x3 LB: > { %s522_s16 = sadd.s32 4294967295, %s705_s15   ;;  %s523_s17 = sadd.s32 4294967294, %s705_s15   ;;  %s705_s15 = sphi %s734_s15, %s958_s15   ;;  %s701_s14 = sphi %s732_s14, %s957_s14   ;;  %s697_s13 = sphi %s730_s13, %s956_s13   ;;  %s693_s12 = sphi %s728_s12, %s955_s12  }
   0x4   : > { %s751_s18 = sadd.s32 1, %s705_s15   ;;  %s44_s19 = sadd.s32 1, %s701_s14 }
   0x5   : > { %s41_s20 = ssub.s32 %s705_s15, %s751_s18  ;;  %p51_p0 = scmp.ne.s32.totalorder %s701_s14, %s697_s13 }
   0x6   : > { %p42_p1 = scmp.eq.s32.totalorder %s41_s20, 0  ;;  %p52_p2 = scmp.eq.s32.totalorder %s705_s15, 0 }
   0x7   : > { %p102_p3 = scmp.eq.s32.totalorder %s522_s16, 1  ;;  %p107_p4 = scmp.ne.s32.totalorder %s697_s13, %s693_s12 }
   0x8   : > { %s764_s21 = scalar_select %p42_p1, %s701_s14, %s44_s19  }
   0x9   : > { %p53_p5 = por %p52_p2, %p51_p0  ;;  %p766_p6 = por %p102_p3, %p51_p0 }
   0xa   : > { %p108_p7 = scmp.eq.s32.totalorder %s523_s17, 1  ;;  %p525_p9 = scmp.ge.s32.totalorder %s705_s15, 2 }
   0xc   : > { %p770_p8 = por %p108_p7, %p107_p4  ;;  %130 = sbr.rel (%p525_p9) target bundleno = 39 (0x27), region = 24 }
  0x13   : > { %133 = sbr.rel (!%p53_p5) target bundleno = 39 (0x27), region = 28  ;;  %s135_s24 = sand.u32 (%p53_p5), 1, %s701_s14  }
  0x14   : > { %s527_s25 = sshll.u32 (%p53_p5), %s705_s15, 3  ;;  %s526_s26 = sshll.u32 (%p53_p5), %s135_s24, 8 }
  0x15   : > { %s782_s29 = scalar_lea.vmem (%p53_p5), %s950_s1, %s527_s25  ;;  %s787_s30 = scalar_lea.vmem (%p53_p5), [#allocation2], %s526_s26 }
  0x16   : > { %v229_v0 = vld [vmem:[%s782_s29] sm:$0xff] (%p53_p5)  ;;  %v231_v1 = vld [vmem:[%s782_s29 + $0x10] sm:$0xff] (%p53_p5) }
  0x17   : > { %v233_v2 = vld [vmem:[%s782_s29 + $0x20] sm:$0xff] (%p53_p5)  ;;  %230 = vst [vmem:[%s787_s30] sm:$0xff] (%p53_p5), %v229_v0  ;;  %232 = vst [vmem:[%s787_s30 + $0x8] sm:$0xff] (%p53_p5), %v231_v1  ;;  %v235_v3 = vld [vmem:[%s782_s29 + $0x30] sm:$0xff] (%p53_p5) }
  0x18   : > { %234 = vst [vmem:[%s787_s30 + $0x10] sm:$0xff] (%p53_p5), %v233_v2  ;;  %v237_v4 = vld [vmem:[%s782_s29 + $0x40] sm:$0xff] (%p53_p5)  ;;  %v239_v5 = vld [vmem:[%s782_s29 + $0x50] sm:$0xff] (%p53_p5)  ;;  %236 = vst [vmem:[%s787_s30 + $0x18] sm:$0xff] (%p53_p5), %v235_v3 }
  0x19   : > { %238 = vst [vmem:[%s787_s30 + $0x20] sm:$0xff] (%p53_p5), %v237_v4  ;;  %240 = vst [vmem:[%s787_s30 + $0x28] sm:$0xff] (%p53_p5), %v239_v5  ;;  %v241_v6 = vld [vmem:[%s782_s29 + $0x60] sm:$0xff] (%p53_p5)  ;;  %v243_v7 = vld [vmem:[%s782_s29 + $0x70] sm:$0xff] (%p53_p5) }
  0x1a   : > { %v245_v8 = vld [vmem:[%s782_s29 + $0x80] sm:$0xff]  ;;  %242 = vst [vmem:[%s787_s30 + $0x30] sm:$0xff] %v241_v6  ;;  %244 = vst [vmem:[%s787_s30 + $0x38] sm:$0xff] %v243_v7  ;;  %v247_v9 = vld [vmem:[%s782_s29 + $0x90] sm:$0xff] }
  0x1b   : > { %246 = vst [vmem:[%s787_s30 + $0x40] sm:$0xff] %v245_v8  ;;  %v249_v10 = vld [vmem:[%s782_s29 + $0xa0] sm:$0xff]  ;;  %v251_v11 = vld [vmem:[%s782_s29 + $0xb0] sm:$0xff]  ;;  %248 = vst [vmem:[%s787_s30 + $0x48] sm:$0xff] %v247_v9 }
  0x1c   : > { %250 = vst [vmem:[%s787_s30 + $0x50] sm:$0xff] %v249_v10  ;;  %252 = vst [vmem:[%s787_s30 + $0x58] sm:$0xff] %v251_v11  ;;  %v253_v12 = vld [vmem:[%s782_s29 + $0xc0] sm:$0xff]  ;;  %v255_v13 = vld [vmem:[%s782_s29 + $0xd0] sm:$0xff] }
  0x1d   : > { %v257_v14 = vld [vmem:[%s782_s29 + $0xe0] sm:$0xff]  ;;  %254 = vst [vmem:[%s787_s30 + $0x60] sm:$0xff] %v253_v12  ;;  %256 = vst [vmem:[%s787_s30 + $0x68] sm:$0xff] %v255_v13  ;;  %v259_v15 = vld [vmem:[%s782_s29 + $0xf0] sm:$0xff] }
  0x1e   : > { %258 = vst [vmem:[%s787_s30 + $0x70] sm:$0xff] %v257_v14  ;;  %v261_v16 = vld [vmem:[%s782_s29 + $0x100] sm:$0xff]  ;;  %v263_v17 = vld [vmem:[%s782_s29 + $0x110] sm:$0xff]  ;;  %260 = vst [vmem:[%s787_s30 + $0x78] sm:$0xff] %v259_v15 }
  0x1f   : > { %262 = vst [vmem:[%s787_s30 + $0x80] sm:$0xff] %v261_v16  ;;  %264 = vst [vmem:[%s787_s30 + $0x88] sm:$0xff] %v263_v17  ;;  %v265_v18 = vld [vmem:[%s782_s29 + $0x120] sm:$0xff]  ;;  %v267_v19 = vld [vmem:[%s782_s29 + $0x130] sm:$0xff] }
  0x20   : > { %v269_v20 = vld [vmem:[%s782_s29 + $0x140] sm:$0xff]  ;;  %266 = vst [vmem:[%s787_s30 + $0x90] sm:$0xff] %v265_v18  ;;  %268 = vst [vmem:[%s787_s30 + $0x98] sm:$0xff] %v267_v19  ;;  %v271_v21 = vld [vmem:[%s782_s29 + $0x150] sm:$0xff] }
  0x21   : > { %270 = vst [vmem:[%s787_s30 + $0xa0] sm:$0xff] %v269_v20  ;;  %v273_v22 = vld [vmem:[%s782_s29 + $0x160] sm:$0xff]  ;;  %v275_v23 = vld [vmem:[%s782_s29 + $0x170] sm:$0xff]  ;;  %272 = vst [vmem:[%s787_s30 + $0xa8] sm:$0xff] %v271_v21 }
  0x22   : > { %274 = vst [vmem:[%s787_s30 + $0xb0] sm:$0xff] %v273_v22  ;;  %276 = vst [vmem:[%s787_s30 + $0xb8] sm:$0xff] %v275_v23  ;;  %v277_v24 = vld [vmem:[%s782_s29 + $0x180] sm:$0xff]  ;;  %v279_v25 = vld [vmem:[%s782_s29 + $0x190] sm:$0xff] }
  0x23   : > { %v281_v26 = vld [vmem:[%s782_s29 + $0x1a0] sm:$0xff]  ;;  %278 = vst [vmem:[%s787_s30 + $0xc0] sm:$0xff] %v277_v24  ;;  %280 = vst [vmem:[%s787_s30 + $0xc8] sm:$0xff] %v279_v25  ;;  %v283_v27 = vld [vmem:[%s782_s29 + $0x1b0] sm:$0xff] }
  0x24   : > { %282 = vst [vmem:[%s787_s30 + $0xd0] sm:$0xff] %v281_v26  ;;  %v285_v28 = vld [vmem:[%s782_s29 + $0x1c0] sm:$0xff]  ;;  %v287_v29 = vld [vmem:[%s782_s29 + $0x1d0] sm:$0xff]  ;;  %284 = vst [vmem:[%s787_s30 + $0xd8] sm:$0xff] %v283_v27 }
  0x25   : > { %286 = vst [vmem:[%s787_s30 + $0xe0] sm:$0xff] %v285_v28  ;;  %288 = vst [vmem:[%s787_s30 + $0xe8] sm:$0xff] %v287_v29  ;;  %v289_v30 = vld [vmem:[%s782_s29 + $0x1e0] sm:$0xff]  ;;  %v291_v31 = vld [vmem:[%s782_s29 + $0x1f0] sm:$0xff] }
  0x26   : > { %290 = vst [vmem:[%s787_s30 + $0xf0] sm:$0xff] %v289_v30  ;;  %292 = vst [vmem:[%s787_s30 + $0xf8] sm:$0xff] %v291_v31 }
  0x27 PF: > { %p528_p10 = scmp.ge.s32.totalorder %s705_s15, 1  ;;  %p297_p11 = scmp.lt.s32.totalorder %s705_s15, 3 }
  0x29   : > { %p298_p12 = pnand %p528_p10, %p297_p11 }
  0x2a   : > { %s853_s4 = sand.u32 (!%p298_p12), 1, %s697_s13   ;;  %v333_v32 = vld [vmem:[%s949_s0 + $0x8] sm:$0xff] (!%p298_p12)  ;;  %v332_v17 = vld [vmem:[%s949_s0] sm:$0xff] (!%p298_p12)  ;;  %s531_s11 = sshll.u32 (!%p298_p12), %s522_s16, 7 }
  0x2b   : > { %301 = sbr.rel (%p298_p12) target bundleno = 311 (0x137), region = 66  ;;  %s529_s7 = sshll.u32 (!%p298_p12), %s853_s4, 8  ;;  %436 = vmatprep.mubr.f32.mxu0 (!%p298_p12), %v333_v32 }
  0x2c   : > { %s859_s8 = scalar_lea.vmem (!%p298_p12), [#allocation2], %s529_s7  ;;  %s328_s17 = sshra.s32 (!%p298_p12), %s531_s11, 7 }
  0x2d   : > { %v350_v33 = vld [vmem:[%s859_s8 + $0x80] sm:$0xff] (!%p298_p12)  ;;  %v351_v34 = vld [vmem:[%s859_s8 + $0x88] sm:$0xff] (!%p298_p12)  ;;  %v352_v38 = vld [vmem:[%s859_s8 + $0x90] sm:$0xff] (!%p298_p12)  ;;  %s530_s19 = sshll.u32 (!%p298_p12), %s853_s4, 3  ;;  %s330_s25 = scalar_lea.vmem (!%p298_p12), %s951_s2, %s328_s17 }
  0x2e   : > { %v334_v35 = vld [vmem:[%s859_s8] sm:$0xff] (!%p298_p12)  ;;  %v572_v36 = vpack.c.bf16 (!%p298_p12), %v351_v34, %v350_v33  ;;  %v335_v37 = vld [vmem:[%s859_s8 + $0x8] sm:$0xff] (!%p298_p12)  ;;  %v353_v39 = vld [vmem:[%s859_s8 + $0x98] sm:$0xff] (!%p298_p12)  ;;  %s326_s26 = scalar_lea.vmem (!%p298_p12), [#allocation3], %s530_s19  ;;  %s905_s30 = scalar_lea.hbm (!%p298_p12), %s952_s3, %s531_s11 }
  0x2f   : > { %v574_v40 = vpack.c.bf16 (!%p298_p12), %v335_v37, %v334_v35  ;;  %v576_v41 = vpack.c.bf16 (!%p298_p12), %v353_v39, %v352_v38  ;;  %v336_v42 = vld [vmem:[%s859_s8 + $0x10] sm:$0xff] (!%p298_p12)  ;;  %v337_v43 = vld [vmem:[%s859_s8 + $0x18] sm:$0xff] (!%p298_p12)  ;;  %v354_v44 = vld [vmem:[%s859_s8 + $0xa0] sm:$0xff] (!%p298_p12)  ;;  %s457_s27 = sshll.u32 (!%p298_p12), %s326_s26, 4  ;;  %s444_s16 = scalar_lea.sflag (!%p298_p12), [#allocation4], %s853_s4  ;;  %s907_s27 = int_to_ptr.vmem [resolvable:$true] %s457_s27 }
  0x30   : > { %573 = vmatprep.subr.bf16.mxu0 (!%p298_p12), %v572_v36  ;;  %v355_v45 = vld [vmem:[%s859_s8 + $0xa8] sm:$0xff] (!%p298_p12)  ;;  %v578_v46 = vpack.c.bf16 (!%p298_p12), %v337_v43, %v336_v42  ;;  %v338_v48 = vld [vmem:[%s859_s8 + $0x20] sm:$0xff] (!%p298_p12)  ;;  %v356_v50 = vld [vmem:[%s859_s8 + $0xb0] sm:$0xff] (!%p298_p12)  ;;  %s643_s5 = scalar_lea.vmem (!%p298_p12), %s907_s27, 128  ;;  %s707_s6 = smov (!%p298_p12), [#allocation3]  }
  0x31   : > { %575 = vmatpush3.bf16.msra.mxu0 (!%p298_p12), %v574_v40  ;;  %v580_v47 = vpack.c.bf16 (!%p298_p12), %v355_v45, %v354_v44  ;;  %v339_v49 = vld [vmem:[%s859_s8 + $0x28] sm:$0xff] (!%p298_p12)  ;;  %v357_v51 = vld [vmem:[%s859_s8 + $0xb8] sm:$0xff] (!%p298_p12)  ;;  %v340_v54 = vld [vmem:[%s859_s8 + $0x30] sm:$0xff] (!%p298_p12)  ;;  %p644_p13 = scmp.ne.s32.totalorder (!%p298_p12), %s907_s27, %s643_s5  ;;  %s647_s7 = sshll.u32 (!%p298_p12), %s707_s6, 4  ;;  %s648_s7 = int_to_ptr.vmem [resolvable:$false] %s647_s7 }
  0x32   : > { %577 = vmatprep.subr.bf16.mxu0 %v576_v41  ;;  %v582_v52 = vpack.c.bf16 %v339_v49, %v338_v48  ;;  %v584_v53 = vpack.c.bf16 %v357_v51, %v356_v50  ;;  %v341_v55 = vld [vmem:[%s859_s8 + $0x38] sm:$0xff]  ;;  %v358_v56 = vld [vmem:[%s859_s8 + $0xc0] sm:$0xff]  ;;  %v359_v57 = vld [vmem:[%s859_s8 + $0xc8] sm:$0xff]  ;;  %p650_p2 = scmp.lt.s32.totalorder %s907_s27, %s648_s7 }
  0x33   : > { %v586_v58 = vpack.c.bf16 %v341_v55, %v340_v54  ;;  %v588_v59 = vpack.c.bf16 %v359_v57, %v358_v56  ;;  %v342_v60 = vld [vmem:[%s859_s8 + $0x40] sm:$0xff]  ;;  %v343_v61 = vld [vmem:[%s859_s8 + $0x48] sm:$0xff]  ;;  %v360_v62 = vld [vmem:[%s859_s8 + $0xd0] sm:$0xff]  ;;  %p645_p0 = pnand %p644_p13, %p766_p6 }
  0x34   : > { %v361_v63 = vld [vmem:[%s859_s8 + $0xd8] sm:$0xff]  ;;  %v590_v0 = vpack.c.bf16 %v343_v61, %v342_v60  ;;  %v344_v2 = vld [vmem:[%s859_s8 + $0x50] sm:$0xff]  ;;  %v362_v4 = vld [vmem:[%s859_s8 + $0xe0] sm:$0xff] }
  0x35   : > { %579 = vmatpush3.bf16.msra.mxu0 %v578_v46  ;;  %v592_v1 = vpack.c.bf16 %v361_v63, %v360_v62  ;;  %v345_v3 = vld [vmem:[%s859_s8 + $0x58] sm:$0xff]  ;;  %v363_v5 = vld [vmem:[%s859_s8 + $0xe8] sm:$0xff]  ;;  %v346_v8 = vld [vmem:[%s859_s8 + $0x60] sm:$0xff]  ;;  %p646_p1 = pneg %p645_p0 }
  0x36   : > { %581 = vmatprep.subr.bf16.mxu0 %v580_v47  ;;  %v594_v6 = vpack.c.bf16 %v345_v3, %v344_v2  ;;  %v596_v7 = vpack.c.bf16 %v363_v5, %v362_v4  ;;  %v347_v9 = vld [vmem:[%s859_s8 + $0x68] sm:$0xff]  ;;  %v364_v10 = vld [vmem:[%s859_s8 + $0xf0] sm:$0xff]  ;;  %v365_v11 = vld [vmem:[%s859_s8 + $0xf8] sm:$0xff] }
  0x37   : > { %v598_v12 = vpack.c.bf16 %v347_v9, %v346_v8  ;;  %v600_v13 = vpack.c.bf16 %v365_v11, %v364_v10  ;;  %v348_v14 = vld [vmem:[%s859_s8 + $0x70] sm:$0xff]  ;;  %v349_v15 = vld [vmem:[%s859_s8 + $0x78] sm:$0xff]  ;;  %v532_v19 = vld [vmem:[%s330_s25] ss:$0 sm:$0xff]  ;;  %s649_s8 = scalar_lea.vmem %s648_s7, 256 }
  0x38   : > { %v602_v16 = vpack.c.bf16 %v349_v15, %v348_v14  ;;  %p651_p3 = scmp.lt.s32.totalorder %s649_s8, %s643_s5 }
  0x39   : > { %583 = vmatpush3.bf16.msra.mxu0 %v582_v52 }
  0x3a   : > { %585 = vmatprep.subr.bf16.mxu0 %v584_v53  ;;  %p652_p4 = por %p651_p3, %p650_p2 }
  0x3c   : > { %p653_p5 = pnand %p652_p4, %p646_p1 }
  0x3d   : > { %587 = vmatpush3.bf16.msra.mxu0 %v586_v58 }
  0x3e   : > { %589 = vmatprep.subr.bf16.mxu0 %v588_v59 }
  0x41   : > { %591 = vmatpush3.bf16.msra.mxu0 %v590_v0 }
  0x42   : > { %593 = vmatprep.subr.bf16.mxu0 %v592_v1 }
  0x45   : > { %595 = vmatpush3.bf16.msra.mxu0 %v594_v6 }
  0x46   : > { %597 = vmatprep.subr.bf16.mxu0 %v596_v7 }
  0x49   : > { %599 = vmatpush3.bf16.msra.mxu0 %v598_v12 }
  0x4a   : > { %601 = vmatprep.subr.bf16.mxu0 %v600_v13 }
  0x4d   : > { %603 = vmatpush3.bf16.msra.mxu0 %v602_v16 }
  0x50   : > { %437 = vmatmul.mubr.f32.vlgmr.msra.gmra.mrb[0].mxu0 %v332_v17 }
 0x123   : > { %v569_v18 = vpop.f32.mrb[0].mxu0 }
 0x124   : > { %v570_v20 = vpop.f32.mrb[1].mxu0 }
 0x125   : > { %v571_v21 = vadd.f32 %v570_v20, %v569_v18 }
 0x127   : > { %v439_v22 = vadd.f32 %v571_v21, %v532_v19 }
 0x129   : > { %442 = vst [vmem:[%s326_s26] sm:$0xff] %v439_v22 }
 0x12a   : > { %656 = shalt.err (!%p653_p5)
}
 0x12b   : > { %s657_s4 = scalar_lea.hbm %s905_s30, 128  ;;  %s661_s11 = scalar_lea.hbm %s952_s3, 256 }
 0x12c   : > { %p658_p7 = scmp.ne.s32.totalorder %s905_s30, %s657_s4  ;;  %p662_p12 = scmp.lt.u32.totalorder %s905_s30, %s952_s3 }
 0x12d   : > { %p663_p13 = scmp.lt.u32.totalorder %s661_s11, %s657_s4  ;;  %p665_p1 = scmp.lt.u32.totalorder %s657_s4, %s905_s30 }
 0x12e   : > { %p659_p10 = pnand %p658_p7, %p766_p6 }
 0x12f   : > { %p664_p0 = por %p663_p13, %p662_p12 }
 0x130   : > { %p660_p11 = pneg %p659_p10 }
 0x131   : > { %p666_p2 = por %p665_p1, %p664_p0 }
 0x133   : > { %p667_p3 = pnand %p666_p2, %p660_p11 }
 0x135   : > { %670 = shalt.err (!%p667_p3)
}
 0x136   : > { %604 = dma.vmem_to_hbm [thread:$0]  (%p766_p6), %s907_s27, 128, %s905_s30, %s444_s16  }
 0x137 PF: > { %s469_s20 = sand.u32 1, %s693_s12   ;;  %p607_p4 = pnand %p525_p9, %p770_p8 }
 0x138   : > { %s470_s24 = scalar_lea.sflag [#allocation4], %s469_s20 }
 0x139   : > { %688 = dma.done.wait (!%p607_p4), %s470_s24, 128  }
 0x13a   : > { %690 = vsyncadd (!%p607_p4), %s470_s24, 4294967168  ;;  %p13_p5 = scmp.ge.s32.totalorder %s751_s18, 4   ;;  %s955_s12 = smov %s697_s13 }
 0x13b   : > { %s956_s13 = smov %s701_s14  ;;  %s957_s14 = smov %s764_s21 }
 0x13c   : > { %s958_s15 = smov %s751_s18  ;;  %15 = sbr.rel (!%p13_p5) target bundleno = 3 (0x3), region = 111 }
 0x143   :  { %475 = vsyncpa [#allocation4], 1 }
 0x144   :  { %477 = vsyncpa [#allocation4 + $0x1], 1 }

</bundles_post_ra>
